<compile_context>
chip_gen: v7x
topology: tpu7x:2x2x1
jax: 0.10.0
libtpu: 0.0.40
codegen_flags: <defaults>
</compile_context>

<pallas_src>
import math

import jax
import jax.numpy as jnp
from jax.experimental import pallas as pl
from jax.experimental.pallas import tpu as pltpu


def _round_up(x, m):
    return ((x + m - 1) // m) * m


def _make_fused_kernel(num_layers):
    def kernel(x_ref, *args):
        # args = (w_0, shift_0, ..., w_{L-1}, shift_{L-1}, o_ref)
        o_ref = args[-1]
        h = x_ref[...]                                 # (C_in, tn), input dtype
        for i in range(num_layers):
            w = args[2 * i][...]                       # (C_out_i, C_in_i), BN scale folded
            shift = args[2 * i + 1][...]               # (C_out_i, 1), f32
            rhs = h if h.dtype == w.dtype else h.astype(w.dtype)
            h = jnp.dot(w, rhs, preferred_element_type=jnp.float32)   # MXU, (C_out, tn)
            h = h + shift                              # folded conv bias + BN shift
            if i != num_layers - 1:
                h = jnp.maximum(h, 0.0)
        o_ref[...] = h.astype(o_ref.dtype)
    return kernel


def _choose_tn(batch, n, channel_dims, *,
               budget_bytes=20 * 1024 * 1024, max_tn=2048):
    """Largest lane tile along N (multiple of 128) whose padded, double-buffered
    f32 working set fits a conservative VMEM budget (valid on v5e/v6e/v7x)."""
    def pad8(c):
        return _round_up(max(int(c), 1), 8)

    # Resident operands (constant index_map, still double-buffered by Pallas).
    resident = 0
    for ci, co in zip(channel_dims[:-1], channel_dims[1:]):
        resident += 2 * pad8(co) * _round_up(ci, 128) * 4      # weight
        resident += 2 * pad8(co) * 128 * 4                     # shift (lane-padded)

    # Per-N-column bytes: double-buffered input/output tiles + one live f32
    # intermediate per layer (conservative upper bound).
    per_col = 4 * (2 * pad8(channel_dims[0]) + 2 * pad8(channel_dims[-1])
                   + sum(pad8(c) for c in channel_dims[1:]))

    if n <= 128:
        # Block last dim equal to the full array dim satisfies the (8,128) rule.
        return n, 1

    avail = max(budget_bytes - resident, 128 * per_col)
    tn = (avail // per_col // 128) * 128
    tn = max(128, min(int(tn), max_tn, _round_up(n, 128)))
    n_blocks = -(-n // tn)

    # v7x has 2 TensorCores sharing VMEM: prefer an even total grid count so
    # neither core runs a tail step alone (shrinking tn only lowers VMEM use).
    if (batch * n_blocks) % 2 == 1:
        for cand in range(tn, 127, -128):
            nb = -(-n // cand)
            if (batch * nb) % 2 == 0:
                tn, n_blocks = cand, nb
                break
    return tn, n_blocks


def base_learner_forward(x, conv_weights, conv_biases, bn_gammas, bn_betas,
                         bn_means, bn_vars, *, eps=1e-5):
    """Fused Pallas forward of BaseLearner (eval-mode BatchNorm).

    x:            (B, C_in, N)
    conv_weights: list of (C_out_i, C_in_i[, 1]) PyTorch Conv1d weights
    conv_biases:  list of (C_out_i,)
    bn_*:         BatchNorm1d gamma/beta/running_mean/running_var, (C_out_i,)
    Returns (B, C_last, N) in x.dtype.
    """
    num_layers = len(conv_weights)
    B, c_in, N = x.shape

    # bf16/fp16 inputs keep bf16/fp16 weights (MXU upconverts, f32 accumulate);
    # otherwise weights stay f32.
    param_dtype = x.dtype if x.dtype in (jnp.bfloat16, jnp.float16) else jnp.float32

    # Fold per layer:  y = (scale * W) @ x + shift   with
    #   scale = gamma / sqrt(var + eps),  shift = (bias - mean) * scale + beta
    kernel_args = []
    channel_dims = [c_in]
    for i in range(num_layers):
        w = conv_weights[i]
        if w.ndim == 3:
            w = w[..., 0]                                   # (C_out, C_in)
        c_out, c_in_i = w.shape
        assert c_in_i == channel_dims[-1]
        inv_std = 1.0 / jnp.sqrt(bn_vars[i].astype(jnp.float32) + eps)
        scale = bn_gammas[i].astype(jnp.float32) * inv_std
        shift = (conv_biases[i].astype(jnp.float32)
                 - bn_means[i].astype(jnp.float32)) * scale \
                + bn_betas[i].astype(jnp.float32)
        w_folded = (w.astype(jnp.float32) * scale[:, None]).astype(param_dtype)
        kernel_args += [w_folded, shift.reshape(c_out, 1)]
        channel_dims.append(c_out)

    c_last = channel_dims[-1]
    tn, n_blocks = _choose_tn(B, N, channel_dims)
    grid = (B, n_blocks)

    # Channels are never tiled (block dim == full dim), N is lane-tiled.
    in_specs = [pl.BlockSpec((None, c_in, tn), lambda b, n: (b, 0, n))]
    for li in range(num_layers):
        ci, co = channel_dims[li], channel_dims[li + 1]
        in_specs += [
            pl.BlockSpec((co, ci), lambda b, n: (0, 0)),    # folded weight (resident)
            pl.BlockSpec((co, 1), lambda b, n: (0, 0)),     # folded shift  (resident)
        ]
    out_specs = pl.BlockSpec((None, c_last, tn), lambda b, n: (b, 0, n))

    flops = 2 * B * N * sum(channel_dims[i] * channel_dims[i + 1]
                            for i in range(num_layers))
    bytes_accessed = (x.size * x.dtype.itemsize
                      + B * c_last * N * x.dtype.itemsize
                      + sum(int(a.size) * a.dtype.itemsize for a in kernel_args))

    y = pl.pallas_call(
        _make_fused_kernel(num_layers),
        out_shape=jax.ShapeDtypeStruct((B, c_last, N), x.dtype),
        grid_spec=pltpu.PrefetchScalarGridSpec(
            num_scalar_prefetch=0,
            grid=grid,
            in_specs=in_specs,
            out_specs=out_specs,
        ),
        compiler_params=pltpu.CompilerParams(
            dimension_semantics=("parallel", "parallel"),
            vmem_limit_bytes=32 * 1024 * 1024,   # safe per-core on v5e/v6e/v7x
        ),
        cost_estimate=pl.CostEstimate(
            flops=int(flops), transcendentals=0,
            bytes_accessed=int(bytes_accessed)),
    )(x, *kernel_args)

    return y


if __name__ == "__main__":
    key = jax.random.PRNGKey(0)
    B, in_channels, N = 2, 4, 16
    params = [32, 32]   # two Conv1d(k=1)+BN layers, ReLU between them

    keys = jax.random.split(key, 1 + 6 * len(params))
    x = jax.random.normal(keys[0], (B, in_channels, N), dtype=jnp.float32)

    conv_w, conv_b, gammas, betas, means, variances = [], [], [], [], [], []
    c_prev = in_channels
    ki = 1
    for c_out in params:
        bound = 1.0 / math.sqrt(c_prev)
        conv_w.append(jax.random.uniform(keys[ki], (c_out, c_prev, 1),
                                         minval=-bound, maxval=bound,
                                         dtype=jnp.float32)); ki += 1
        conv_b.append(jax.random.uniform(keys[ki], (c_out,),
                                         minval=-bound, maxval=bound,
                                         dtype=jnp.float32)); ki += 1
        gammas.append(1.0 + 0.1 * jax.random.normal(keys[ki], (c_out,),
                                                    dtype=jnp.float32)); ki += 1
        betas.append(0.1 * jax.random.normal(keys[ki], (c_out,),
                                             dtype=jnp.float32)); ki += 1
        means.append(0.1 * jax.random.normal(keys[ki], (c_out,),
                                             dtype=jnp.float32)); ki += 1
        variances.append(jax.random.uniform(keys[ki], (c_out,),
                                            minval=0.5, maxval=1.5,
                                            dtype=jnp.float32)); ki += 1
        c_prev = c_out

    y = base_learner_forward(x, conv_w, conv_b, gammas, betas, means, variances)
    y = jax.block_until_ready(y)

    # Pure-JAX reference: Conv1d(k=1) + inference BatchNorm1d + ReLU between layers.
    eps = 1e-5
    h = x
    for i in range(len(params)):
        w = conv_w[i][..., 0]
        h = jnp.einsum('oc,bcn->bon', w, h) + conv_b[i][None, :, None]
        h = (h - means[i][None, :, None]) / jnp.sqrt(variances[i][None, :, None] + eps)
        h = h * gammas[i][None, :, None] + betas[i][None, :, None]
        if i != len(params) - 1:
            h = jnp.maximum(h, 0.0)

    assert y.shape == (B, params[-1], N)
    assert jnp.allclose(y, h, atol=1e-4, rtol=1e-4), float(jnp.max(jnp.abs(y - h)))

    print("KERNEL_OK")
</pallas_src>

<mosaic_0001>
module attributes {stable_mosaic.version = 11 : i64} {
  func.func @kernel(%arg0: i32, %arg1: i32, %arg2: memref<1x4x16xf32, #tpu.memory_space<vmem>>, %arg3: memref<32x4xf32, #tpu.memory_space<vmem>>, %arg4: memref<32x1xf32, #tpu.memory_space<vmem>>, %arg5: memref<32x32xf32, #tpu.memory_space<vmem>>, %arg6: memref<32x1xf32, #tpu.memory_space<vmem>>, %arg7: memref<1x32x16xf32, #tpu.memory_space<vmem>>) attributes {dimension_semantics = [#tpu.dimension_semantics<parallel>, #tpu.dimension_semantics<parallel>], iteration_bounds = array<i64: 2, 1>, scalar_prefetch = 0 : i64, scratch_operands = 0 : i64, tpu.core_type = #tpu.core_type<tc>, window_params = [{transform_indices = @transform_0, window_bounds = array<i64: 1, 4, 16>}, {pipeline_mode = #tpu.pipeline_mode<synchronous>, transform_indices = @transform_1, window_bounds = array<i64: 32, 4>}, {pipeline_mode = #tpu.pipeline_mode<synchronous>, transform_indices = @transform_2, window_bounds = array<i64: 32, 1>}, {pipeline_mode = #tpu.pipeline_mode<synchronous>, transform_indices = @transform_3, window_bounds = array<i64: 32, 32>}, {pipeline_mode = #tpu.pipeline_mode<synchronous>, transform_indices = @transform_4, window_bounds = array<i64: 32, 1>}, {transform_indices = @transform_5, window_bounds = array<i64: 1, 32, 16>}]} {
    %c0 = arith.constant 0 : index
    %c0_0 = arith.constant 0 : index
    %c0_1 = arith.constant 0 : index
    %0 = vector.load %arg2[%c0, %c0_0, %c0_1] : memref<1x4x16xf32, #tpu.memory_space<vmem>>, vector<1x4x16xf32>
    %1 = vector.shape_cast %0 : vector<1x4x16xf32> to vector<4x16xf32>
    %c0_2 = arith.constant 0 : index
    %c0_3 = arith.constant 0 : index
    %2 = vector.load %arg3[%c0_2, %c0_3] : memref<32x4xf32, #tpu.memory_space<vmem>>, vector<32x4xf32>
    %c0_4 = arith.constant 0 : index
    %c0_5 = arith.constant 0 : index
    %3 = vector.load %arg4[%c0_4, %c0_5] : memref<32x1xf32, #tpu.memory_space<vmem>>, vector<32x1xf32>
    %cst = arith.constant dense<0.000000e+00> : vector<32x16xf32>
    %4 = tpu.matmul %2, %1, %cst {dimension_numbers = #tpu.dot_dimension_numbers<[1], [0], [0], [1], [0, 0, 1, 1], [], []>} : vector<32x4xf32>, vector<4x16xf32>, vector<32x16xf32> -> vector<32x16xf32>
    %5 = vector.broadcast %3 : vector<32x1xf32> to vector<32x16xf32>
    %6 = arith.addf %4, %5 : vector<32x16xf32>
    %cst_6 = arith.constant 0.000000e+00 : f32
    %7 = vector.broadcast %cst_6 : f32 to vector<32x16xf32>
    %8 = arith.maximumf %6, %7 : vector<32x16xf32>
    %c0_7 = arith.constant 0 : index
    %c0_8 = arith.constant 0 : index
    %9 = vector.load %arg5[%c0_7, %c0_8] : memref<32x32xf32, #tpu.memory_space<vmem>>, vector<32x32xf32>
    %c0_9 = arith.constant 0 : index
    %c0_10 = arith.constant 0 : index
    %10 = vector.load %arg6[%c0_9, %c0_10] : memref<32x1xf32, #tpu.memory_space<vmem>>, vector<32x1xf32>
    %cst_11 = arith.constant dense<0.000000e+00> : vector<32x16xf32>
    %11 = tpu.matmul %9, %8, %cst_11 {dimension_numbers = #tpu.dot_dimension_numbers<[1], [0], [0], [1], [0, 0, 1, 1], [], []>} : vector<32x32xf32>, vector<32x16xf32>, vector<32x16xf32> -> vector<32x16xf32>
    %12 = vector.broadcast %10 : vector<32x1xf32> to vector<32x16xf32>
    %13 = arith.addf %11, %12 : vector<32x16xf32>
    %c0_12 = arith.constant 0 : index
    %c0_13 = arith.constant 0 : index
    %c0_14 = arith.constant 0 : index
    %14 = vector.load %arg7[%c0_12, %c0_13, %c0_14] : memref<1x32x16xf32, #tpu.memory_space<vmem>>, vector<1x32x16xf32>
    %15 = vector.shape_cast %14 : vector<1x32x16xf32> to vector<32x16xf32>
    %16 = vector.shape_cast %13 : vector<32x16xf32> to vector<1x32x16xf32>
    tpu.vector_store %arg7[%c0_12, %c0_13, %c0_14], %16 {strides = array<i32>} : memref<1x32x16xf32, #tpu.memory_space<vmem>>, vector<1x32x16xf32>,
    return
  }
  func.func @transform_0(%arg0: i32, %arg1: i32) -> (i32, i32, i32) {
    %c0_i32 = arith.constant 0 : i32
    %c0_i32_0 = arith.constant 0 : i32
    return %arg0, %c0_i32, %arg1 : i32, i32, i32
  }
  func.func @transform_1(%arg0: i32, %arg1: i32) -> (i32, i32) {
    %c0_i32 = arith.constant 0 : i32
    %c0_i32_0 = arith.constant 0 : i32
    %c0_i32_1 = arith.constant 0 : i32
    return %c0_i32, %c0_i32_0 : i32, i32
  }
  func.func @transform_2(%arg0: i32, %arg1: i32) -> (i32, i32) {
    %c0_i32 = arith.constant 0 : i32
    %c0_i32_0 = arith.constant 0 : i32
    %c0_i32_1 = arith.constant 0 : i32
    return %c0_i32, %c0_i32_0 : i32, i32
  }
  func.func @transform_3(%arg0: i32, %arg1: i32) -> (i32, i32) {
    %c0_i32 = arith.constant 0 : i32
    %c0_i32_0 = arith.constant 0 : i32
    %c0_i32_1 = arith.constant 0 : i32
    return %c0_i32, %c0_i32_0 : i32, i32
  }
  func.func @transform_4(%arg0: i32, %arg1: i32) -> (i32, i32) {
    %c0_i32 = arith.constant 0 : i32
    %c0_i32_0 = arith.constant 0 : i32
    %c0_i32_1 = arith.constant 0 : i32
    return %c0_i32, %c0_i32_0 : i32, i32
  }
  func.func @transform_5(%arg0: i32, %arg1: i32) -> (i32, i32, i32) {
    %c0_i32 = arith.constant 0 : i32
    %c0_i32_0 = arith.constant 0 : i32
    return %arg0, %c0_i32, %arg1 : i32, i32, i32
  }
}

</mosaic_0001>

<bundles_post_ra>
// kernel: tpu_custom_call.1
= control target key start
LH: loop header
LB: loop body
LE: loop exit
PB: predicated region body
PF: predicated region fallthrough
CT: control target
= control target key end

     0   :  { %s748_s18 = smov 0   ;;  %s750_s19 = smov 0   ;;  %s841_s0 = inlined_call_operand.vmem [shape: f32[2,4,16], index: 0, kind: input, shape index: {}]   ;;  %s842_s1 = inlined_call_operand.vmem [shape: f32[32,4], index: 1, kind: input, shape index: {}]   ;;  %s843_s2 = inlined_call_operand.vmem [shape: f32[32,1], index: 2, kind: input, shape index: {}]   ;;  %s844_s3 = inlined_call_operand.vmem [shape: f32[32,32], index: 3, kind: input, shape index: {}]   ;;  %s845_s4 = inlined_call_operand.vmem [shape: f32[32,1], index: 4, kind: input, shape index: {}]   ;;  %s846_s5 = inlined_call_operand.vmem [shape: f32[2,32,16], index: 5, kind: output, shape index: {}]  }
   0x1   :  { %s752_s20 = smov 0  }
   0x2 LB: > { %s27_s21 = sadd.s32 1, %s711_s19  ;;  %p603_p0 = scmp.ge.s32.totalorder %s715_s20, 1  ;;  %s715_s20 = sphi %s752_s20, %s15_s20   ;;  %s711_s19 = sphi %s750_s19, %s848_s19   ;;  %s707_s18 = sphi %s748_s18, %s847_s18  }
   0x3   : > { %p29_p1 = scmp.ge.s32.totalorder %s27_s21, 2  ;;  %p205_p2 = scmp.lt.s32.totalorder %s715_s20, 3 }
   0x5   : > { %s850_s21 = smov (%p29_p1, %s27_s21), 0  ;;  %p206_p3 = pnand %p603_p0, %p205_p2 }
   0x6   : > { %p238_p4 = scmp.lt.s32.totalorder (!%p206_p3), %s707_s18, 1  ;;  %v254_v0 = vld [vmem:[%s842_s1] sm:$0xff] (!%p206_p3)  ;;  %vm282_vm0 = vcmask (!%p206_p3), 31744   ;;  %v260_v2 = vld [vmem:[%s843_s2 + $0x10] sm:$0xff] (!%p206_p3)  ;;  %v717_v3 = vmov (!%p206_p3), 0   ;;  %vm295_vm1 = vcmask (!%p206_p3), 1043456  }
   0x7   : > { %209 = sbr.rel (%p206_p3) target bundleno = 463 (0x1cf), region = 40  ;;  %634 = vmatprep.mubr.msk.f32.mxu0 (!%p206_p3), %vm282_vm0, %v254_v0  ;;  %v258_v1 = vld [vmem:[%s843_s2] sm:$0xff] (!%p206_p3)  ;;  %691 = vset.pattern.permute.xlu0 (!%p206_p3), %v717_v3  ;;  %v259_v4 = vld [vmem:[%s843_s2 + $0x8] sm:$0xff] (!%p206_p3)  ;;  %v261_v5 = vld [vmem:[%s843_s2 + $0x18] sm:$0xff] (!%p206_p3)  ;;  %vm416_vm2 = vcmask (!%p206_p3), 261120   ;;  %vm514_vm3 = vcmask (!%p206_p3), 130048  }
   0x8   : > { %692 = vset.pattern.permute.xlu1 (!%p206_p3), %v717_v3  ;;  %264 = vperm.xlu0 (!%p206_p3), %691, %v258_v1   ;;  %v255_v7 = vld [vmem:[%s842_s1 + $0x8] sm:$0xff] (!%p206_p3)  ;;  %v256_v8 = vld [vmem:[%s842_s1 + $0x10] sm:$0xff] (!%p206_p3)  ;;  %v392_v9 = vld [vmem:[%s845_s4] sm:$0xff] (!%p206_p3) }
   0x9   : > { %274 = vperm.xlu1 (!%p206_p3), %692, %v260_v2   ;;  %v393_v10 = vld [vmem:[%s845_s4 + $0x8] sm:$0xff] (!%p206_p3)  ;;  %v257_v11 = vld [vmem:[%s842_s1 + $0x18] sm:$0xff] (!%p206_p3)  ;;  %v394_v12 = vld [vmem:[%s845_s4 + $0x10] sm:$0xff] (!%p206_p3) }
   0xa   : > { %v395_v13 = vld [vmem:[%s845_s4 + $0x18] sm:$0xff] (!%p206_p3)  ;;  %v388_v14 = vld [vmem:[%s844_s3] sm:$0xff] (!%p206_p3)  ;;  %v390_v15 = vld [vmem:[%s844_s3 + $0x10] sm:$0xff] (!%p206_p3) }
   0xb   : > { %651 = vmatprep.mubr.msk.f32.mxu1 (!%p206_p3), %vm416_vm2, %v390_v15  ;;  %v389_v34 = vld [vmem:[%s844_s3 + $0x8] sm:$0xff] (!%p206_p3)  ;;  %v391_v35 = vld [vmem:[%s844_s3 + $0x18] sm:$0xff] (!%p206_p3) }
   0xc   : > { %269 = vperm.xlu0 (!%p206_p3), %691, %v259_v4  }
   0xd   : > { %279 = vperm.xlu1 (!%p206_p3), %692, %v261_v5  }
   0xe   : > { %s852_s18 = smov (!%p238_p4, %s707_s18), 1 }
   0xf   : > { %s604_s28 = sshll.u32 %s852_s18, 2  ;;  %s618_s12 = sshll.u32 %s852_s18, 5 }
  0x10   : > { %s244_s8 = scalar_lea.vmem %s841_s0, %s604_s28  ;;  %398 = vperm.xlu0 %691, %v392_v9   ;;  %s252_s15 = scalar_lea.vmem %s846_s5, %s618_s12 }
  0x11   : > { %v253_v6 = vld [vmem:[%s244_s8] sm:$0xf]  ;;  %403 = vperm.xlu1 %692, %v393_v10  }
  0x12   : > { %632 = vmatprep.subr.msk.mxu0 %vm295_vm1, %v253_v6 }
  0x13   : > { %633 = vmatpush3.msk.msra.mxu0 %vm295_vm1, %v253_v6 }
  0x14   : > { %635 = vmatmul.mubr.msk.f32.vlgmr.msra.gmra.mrb[0].mxu0 %vm282_vm0, %v255_v7  ;;  %408 = vperm.xlu0 %691, %v394_v12  }
  0x15   : > { %637 = vmatprep.mubr.msk.f32.mxu0 %vm282_vm0, %v256_v8  ;;  %413 = vperm.xlu1 %692, %v395_v13  }
  0x18   : > { %638 = vmatmul.mubr.msk.f32.gmra.mrb[2].mxu0 %vm282_vm0, %v257_v11 }
  0x19   : > { %648 = vmatprep.mubr.msk.f32.mxu0 %vm416_vm2, %v388_v14 }
  0x87   : > { %v265_v16 = vpop.permute.xlu0 %264 }
  0x88   : > { %v275_v17 = vpop.permute.xlu1 %274 }
  0x8b   : > { %v270_v18 = vpop.permute.xlu0 %269 }
  0x8c   : > { %v280_v24 = vpop.permute.xlu1 %279 }
  0x8f   : > { %v399_v36 = vpop.permute.xlu0 %398 }
  0x90   : > { %v404_v37 = vpop.permute.xlu1 %403 }
  0x93   : > { %v409_v38 = vpop.permute.xlu0 %408 }
  0x94   : > { %v414_v39 = vpop.permute.xlu1 %413 }
  0xe7   : > { %v636_v19 = vpop.f32.mrb[0].mxu0 }
  0xe8   : > { %v371_v20 = vadd.f32 %v636_v19, %v270_v18  ;;  %v365_v21 = vpop.f32.mrb[1].mxu0 }
  0xe9   : > { %v366_v22 = vadd.f32 %v365_v21, %v265_v16 }
  0xea   : > { %v385_v23 = vmax.f32 %v371_v20, 0.0 }
  0xeb   : > { %v384_v25 = vmax.f32 %v366_v22, 0.0  ;;  %v639_v26 = vpop.f32.mrb[2].mxu0 }
  0xec   : > { %v381_v27 = vadd.f32 %v639_v26, %v280_v24  ;;  %v375_v28 = vpop.f32.mrb[3].mxu0 }
  0xed   : > { %v654_v29 = vpack.c.bf16 %v385_v23, %v384_v25  ;;  %v376_v30 = vadd.f32 %v375_v28, %v275_v17 }
  0xee   : > { %v387_v31 = vmax.f32 %v381_v27, 0.0 }
  0xef   : > { %v386_v32 = vmax.f32 %v376_v30, 0.0  ;;  %655 = vmatprep.subr.bf16.mxu0 %v654_v29  ;;  %662 = vmatprep.subr.bf16.mxu1 %v654_v29 }
  0xf0   : > { %657 = vmatpush3.bf16.msra.mxu0 %v654_v29  ;;  %664 = vmatpush3.bf16.msra.mxu1 %v654_v29 }
  0xf1   : > { %v658_v33 = vpack.c.bf16 %v387_v31, %v386_v32 }
  0xf3   : > { %659 = vmatprep.subr.bf16.mxu0 %v658_v33  ;;  %663 = vmatprep.subr.bf16.mxu1 %v658_v33 }
  0xf4   : > { %661 = vmatpush3.bf16.msra.mxu0 %v658_v33  ;;  %665 = vmatpush3.bf16.msra.mxu1 %v658_v33 }
  0xf7   : > { %649 = vmatmul.mubr.msk.f32.vlgmr.msra.gmra.mrb[4].mxu0 %vm416_vm2, %v389_v34  ;;  %652 = vmatmul.mubr.msk.f32.vlgmr.msra.gmra.mrb[0].mxu1 %vm416_vm2, %v391_v35 }
 0x1ca   : > { %v650_v40 = vpop.f32.mrb[4].mxu0  ;;  %v653_v41 = vpop.f32.mrb[0].mxu1 }
 0x1cb   : > { %v501_v42 = vadd.f32 %v650_v40, %v404_v37  ;;  %v511_v43 = vadd.f32 %v653_v41, %v414_v39  ;;  %v495_v44 = vpop.f32.mrb[5].mxu0  ;;  %v505_v45 = vpop.f32.mrb[1].mxu1 }
 0x1cc   : > { %v496_v46 = vadd.f32 %v495_v44, %v399_v36  ;;  %v506_v47 = vadd.f32 %v505_v45, %v409_v38 }
 0x1cd   : > { %516 = vst.msk [vmem:[%s252_s15 + $0x8] sm:$0xff] %vm514_vm3, %v501_v42  ;;  %518 = vst.msk [vmem:[%s252_s15 + $0x18] sm:$0xff] %vm514_vm3, %v511_v43 }
 0x1ce   : > { %515 = vst.msk [vmem:[%s252_s15] sm:$0xff] %vm514_vm3, %v496_v46  ;;  %517 = vst.msk [vmem:[%s252_s15 + $0x10] sm:$0xff] %vm514_vm3, %v506_v47 }
 0x1cf PF: > { %s15_s20 = sadd.s32 1, %s715_s20   ;;  %s847_s18 = smov %s711_s19 }
 0x1d0   : > { %p12_p5 = scmp.ge.s32.totalorder %s15_s20, 4   ;;  %s848_s19 = smov %s850_s21 }
 0x1d2   :  { %14 = sbr.rel (!%p12_p5) target bundleno = 2 (0x2), region = 70 }

</bundles_post_ra>
